<compile_context>
chip_gen: v5e
topology: v5e:2x2
jax: 0.10.0
libtpu: 0.0.40
codegen_flags: <defaults>
</compile_context>

<pallas_src>
import jax
import jax.numpy as jnp
from jax.experimental import pallas as pl
from jax.experimental.pallas import tpu as pltpu

_LANE = 128


def _round_up(x, m):
    return ((x + m - 1) // m) * m


def _make_dense_kernel(n_hidden_layers: int):
    """x -> [Linear + ReLU] * n_hidden_layers -> Linear(., 1), lane-dense output."""

    def kernel(fps_ref, gep_ref, *refs):
        out_ref = refs[-1]
        params = refs[:-1]  # (w1a, w1b, b1, w2, b2, ..., wN, bN, wf, bf)

        w1a, w1b, b1 = params[0], params[1], params[2]
        # First layer: split matmul replaces concat(fps, gep) @ W1 (bf16 MXU, f32 acc).
        h = (
            jnp.dot(fps_ref[...].astype(jnp.float32).astype(jnp.bfloat16),
                    w1a[...], preferred_element_type=jnp.float32)
            + jnp.dot(gep_ref[...].astype(jnp.bfloat16),
                      w1b[...], preferred_element_type=jnp.float32)
            + b1[...]
        )
        h = jnp.maximum(h, 0.0)  # ReLU (f32 epilogue)

        for i in range(1, n_hidden_layers):
            w = params[1 + 2 * i]
            b = params[2 + 2 * i]
            h = jnp.dot(h.astype(jnp.bfloat16), w[...],
                        preferred_element_type=jnp.float32) + b[...]
            h = jnp.maximum(h, 0.0)

        # Final Linear(H, 1): VPU multiply + lane reduce -> lane-dense (1, TILE_B) store
        # (avoids a 1-wide MXU pass and masked vst.msk partial stores).
        wf = params[-2][...]  # (1, Hp) f32
        bf = params[-1][...]  # (1, 1) f32
        y = jnp.sum(h * wf, axis=1).reshape(1, -1) + bf
        out_ref[...] = y

    return kernel


def dense_forward(fps, gep, layer_weights, layer_biases, final_w, final_b,
                  *, tile_b=256):
    """Pallas-backed forward for the Dense model (inference semantics).

    Args:
      fps: [bs, num_drug_features] int (fingerprint bits).
      gep: [bs, number_of_genes] float32.
      layer_weights: list of (in_i, out_i) float32 (PyTorch weight.T).
      layer_biases:  list of (out_i,) or (1, out_i) float32.
      final_w: (out_last, 1) float32 (PyTorch final weight.T).
      final_b: (1,) or (1, 1) float32.
      tile_b: batch tile size (rounded to a lane multiple when tiling is needed).

    Returns:
      predictions [bs, 1], {'IC50': predictions}
    """
    bs, n_drug = fps.shape
    n_genes = gep.shape[1]
    n_layers = len(layer_weights)
    assert layer_weights[0].shape[0] == n_drug + n_genes

    # --- Zero-pad hidden widths to lane multiples (exact). Weights -> bf16. ---
    padded_w, padded_b = [], []
    prev_pad = None
    for li, (w, b) in enumerate(zip(layer_weights, layer_biases)):
        d_in, d_out = w.shape
        out_pad = _round_up(d_out, _LANE)
        w = jnp.asarray(w, jnp.float32)
        b = jnp.asarray(b, jnp.float32).reshape(1, d_out)
        if li > 0:
            w = jnp.pad(w, ((0, prev_pad - d_in), (0, out_pad - d_out)))
        else:
            w = jnp.pad(w, ((0, 0), (0, out_pad - d_out)))
        b = jnp.pad(b, ((0, 0), (0, out_pad - d_out)))
        padded_w.append(w.astype(jnp.bfloat16))
        padded_b.append(b)
        prev_pad = out_pad

    h_last = layer_weights[-1].shape[1]
    h_last_pad = prev_pad
    wf = jnp.asarray(final_w, jnp.float32).reshape(1, h_last)
    wf = jnp.pad(wf, ((0, 0), (0, h_last_pad - h_last)))       # (1, Hp) f32
    bf = jnp.asarray(final_b, jnp.float32).reshape(1, 1)        # (1, 1)  f32

    # Split first-layer weight rows: fps part / gep part (removes wrapper concat).
    w1a = padded_w[0][:n_drug]
    w1b = padded_w[0][n_drug:]

    # --- Batch tiling. ---
    if bs > tile_b:
        tile = _round_up(tile_b, _LANE)   # lane-dense output blocks when tiling
    else:
        tile = _round_up(bs, 8)
    bs_pad = _round_up(bs, tile)
    grid = (bs_pad // tile,)
    if bs_pad != bs:
        fps = jnp.pad(fps, ((0, bs_pad - bs), (0, 0)))
        gep = jnp.pad(gep, ((0, bs_pad - bs), (0, 0)))

    args = [fps, gep, w1a, w1b, padded_b[0]]
    for w, b in zip(padded_w[1:], padded_b[1:]):
        args += [w, b]
    args += [wf, bf]

    in_specs = [
        pl.BlockSpec((tile, n_drug), lambda i: (i, 0)),
        pl.BlockSpec((tile, n_genes), lambda i: (i, 0)),
    ] + [pl.BlockSpec(a.shape, lambda i: (0, 0)) for a in args[2:]]  # resident params

    out_specs = pl.BlockSpec((1, tile), lambda i: (0, i))
    out_shape = jax.ShapeDtypeStruct((1, bs_pad), jnp.float32)

    # Advisory cost estimate for XLA's scheduler.
    flops = 2 * bs_pad * (
        n_drug * w1a.shape[1]
        + n_genes * w1b.shape[1]
        + sum(w.shape[0] * w.shape[1] for w in padded_w[1:])
        + h_last_pad
    )
    bytes_accessed = sum(int(a.size) * a.dtype.itemsize for a in args) + bs_pad * 4
    cost = pl.CostEstimate(flops=flops, transcendentals=0,
                           bytes_accessed=bytes_accessed)

    out = pl.pallas_call(
        _make_dense_kernel(n_layers),
        out_shape=out_shape,
        grid=grid,
        in_specs=in_specs,
        out_specs=out_specs,
        compiler_params=pltpu.CompilerParams(
            dimension_semantics=("parallel",),
            vmem_limit_bytes=32 * 1024 * 1024,
        ),
        cost_estimate=cost,
    )(*args)

    predictions = out.reshape(bs_pad, 1)[:bs]
    return predictions, {"IC50": predictions}


def _init_linear(key, fan_in, fan_out):
    """Deterministic PyTorch-style Linear init; returns W^T (in,out) and b (1,out)."""
    kw, kb = jax.random.split(key)
    bound = 1.0 / jnp.sqrt(fan_in)
    w_t = jax.random.uniform(kw, (fan_in, fan_out), jnp.float32, -bound, bound)
    b = jax.random.uniform(kb, (1, fan_out), jnp.float32, -bound, bound)
    return w_t, b


if __name__ == "__main__":
    # Small shapes consistent with the module's forward:
    #   fps: [bs, num_drug_features] int, gep: [bs, number_of_genes] float.
    bs = 2
    num_drug_features = 32
    number_of_genes = 96
    # hidden_sizes[0] must equal number_of_genes + num_drug_features.
    hidden_sizes = [number_of_genes + num_drug_features, 64, 32, 16]

    root = jax.random.PRNGKey(0)
    k_fps, k_gep, k_params = jax.random.split(root, 3)

    fps = jax.random.bernoulli(k_fps, 0.5, (bs, num_drug_features)).astype(jnp.int32)
    gep = jax.random.normal(k_gep, (bs, number_of_genes), jnp.float32)

    layer_weights, layer_biases = [], []
    keys = jax.random.split(k_params, len(hidden_sizes))  # last key for final_dense
    for i in range(len(hidden_sizes) - 1):
        w_t, b = _init_linear(keys[i], hidden_sizes[i], hidden_sizes[i + 1])
        layer_weights.append(w_t)
        layer_biases.append(b)
    final_w, final_b = _init_linear(keys[-1], hidden_sizes[-1], 1)

    preds, pred_dict = dense_forward(
        fps, gep, layer_weights, layer_biases, final_w, final_b
    )
    preds = jax.block_until_ready(preds)

    # Pure-JAX reference emulating the kernel's bf16-MXU / f32-accumulate math.
    h = jnp.concatenate([fps.astype(jnp.float32), gep], axis=1)
    for w, b in zip(layer_weights, layer_biases):
        h = jnp.dot(h.astype(jnp.bfloat16), w.astype(jnp.bfloat16),
                    preferred_element_type=jnp.float32) + b
        h = jnp.maximum(h, 0.0)
    ref = h @ final_w + final_b  # final projection stays f32 in the kernel too

    assert preds.shape == (bs, 1)
    assert jnp.allclose(preds, ref, atol=1e-2, rtol=1e-2), (preds, ref)
    assert jnp.allclose(pred_dict["IC50"], preds)

    print("KERNEL_OK")
</pallas_src>

<mosaic_0001>
module attributes {stable_mosaic.version = 11 : i64} {
  func.func @kernel(%arg0: i32, %arg1: memref<8x32xi32, #tpu.memory_space<vmem>>, %arg2: memref<8x96xf32, #tpu.memory_space<vmem>>, %arg3: memref<32x128xbf16, #tpu.memory_space<vmem>>, %arg4: memref<96x128xbf16, #tpu.memory_space<vmem>>, %arg5: memref<1x128xf32, #tpu.memory_space<vmem>>, %arg6: memref<128x128xbf16, #tpu.memory_space<vmem>>, %arg7: memref<1x128xf32, #tpu.memory_space<vmem>>, %arg8: memref<128x128xbf16, #tpu.memory_space<vmem>>, %arg9: memref<1x128xf32, #tpu.memory_space<vmem>>, %arg10: memref<1x128xf32, #tpu.memory_space<vmem>>, %arg11: memref<1x1xf32, #tpu.memory_space<vmem>>, %arg12: memref<1x8xf32, #tpu.memory_space<vmem>>) attributes {dimension_semantics = [#tpu.dimension_semantics<parallel>], iteration_bounds = array<i64: 1>, scalar_prefetch = 0 : i64, scratch_operands = 0 : i64, tpu.core_type = #tpu.core_type<tc>, window_params = [{transform_indices = @transform_0, window_bounds = array<i64: 8, 32>}, {transform_indices = @transform_1, window_bounds = array<i64: 8, 96>}, {pipeline_mode = #tpu.pipeline_mode<synchronous>, transform_indices = @transform_2, window_bounds = array<i64: 32, 128>}, {pipeline_mode = #tpu.pipeline_mode<synchronous>, transform_indices = @transform_3, window_bounds = array<i64: 96, 128>}, {pipeline_mode = #tpu.pipeline_mode<synchronous>, transform_indices = @transform_4, window_bounds = array<i64: 1, 128>}, {pipeline_mode = #tpu.pipeline_mode<synchronous>, transform_indices = @transform_5, window_bounds = array<i64: 128, 128>}, {pipeline_mode = #tpu.pipeline_mode<synchronous>, transform_indices = @transform_6, window_bounds = array<i64: 1, 128>}, {pipeline_mode = #tpu.pipeline_mode<synchronous>, transform_indices = @transform_7, window_bounds = array<i64: 128, 128>}, {pipeline_mode = #tpu.pipeline_mode<synchronous>, transform_indices = @transform_8, window_bounds = array<i64: 1, 128>}, {pipeline_mode = #tpu.pipeline_mode<synchronous>, transform_indices = @transform_9, window_bounds = array<i64: 1, 128>}, {pipeline_mode = #tpu.pipeline_mode<synchronous>, transform_indices = @transform_10, window_bounds = array<i64: 1, 1>}, {transform_indices = @transform_11, window_bounds = array<i64: 1, 8>}]} {
    %c0 = arith.constant 0 : index
    %c0_0 = arith.constant 0 : index
    %0 = vector.load %arg1[%c0, %c0_0] : memref<8x32xi32, #tpu.memory_space<vmem>>, vector<8x32xi32>
    %1 = arith.sitofp %0 : vector<8x32xi32> to vector<8x32xf32>
    %2 = arith.truncf %1 : vector<8x32xf32> to vector<8x32xbf16>
    %c0_1 = arith.constant 0 : index
    %c0_2 = arith.constant 0 : index
    %3 = vector.load %arg3[%c0_1, %c0_2] : memref<32x128xbf16, #tpu.memory_space<vmem>>, vector<32x128xbf16>
    %cst = arith.constant dense<0.000000e+00> : vector<8x128xf32>
    %4 = tpu.matmul %2, %3, %cst {dimension_numbers = #tpu.dot_dimension_numbers<[1], [0], [0], [1], [0, 0, 1, 1], [], []>} : vector<8x32xbf16>, vector<32x128xbf16>, vector<8x128xf32> -> vector<8x128xf32>
    %c0_3 = arith.constant 0 : index
    %c0_4 = arith.constant 0 : index
    %5 = vector.load %arg2[%c0_3, %c0_4] : memref<8x96xf32, #tpu.memory_space<vmem>>, vector<8x96xf32>
    %6 = arith.truncf %5 : vector<8x96xf32> to vector<8x96xbf16>
    %c0_5 = arith.constant 0 : index
    %c0_6 = arith.constant 0 : index
    %7 = vector.load %arg4[%c0_5, %c0_6] : memref<96x128xbf16, #tpu.memory_space<vmem>>, vector<96x128xbf16>
    %cst_7 = arith.constant dense<0.000000e+00> : vector<8x128xf32>
    %8 = tpu.matmul %6, %7, %cst_7 {dimension_numbers = #tpu.dot_dimension_numbers<[1], [0], [0], [1], [0, 0, 1, 1], [], []>} : vector<8x96xbf16>, vector<96x128xbf16>, vector<8x128xf32> -> vector<8x128xf32>
    %9 = arith.addf %4, %8 : vector<8x128xf32>
    %c0_8 = arith.constant 0 : index
    %c0_9 = arith.constant 0 : index
    %10 = vector.load %arg5[%c0_8, %c0_9] : memref<1x128xf32, #tpu.memory_space<vmem>>, vector<1x128xf32>
    %11 = vector.broadcast %10 : vector<1x128xf32> to vector<8x128xf32>
    %12 = arith.addf %9, %11 : vector<8x128xf32>
    %cst_10 = arith.constant 0.000000e+00 : f32
    %13 = vector.broadcast %cst_10 : f32 to vector<8x128xf32>
    %14 = arith.maximumf %12, %13 : vector<8x128xf32>
    %15 = arith.truncf %14 : vector<8x128xf32> to vector<8x128xbf16>
    %c0_11 = arith.constant 0 : index
    %c0_12 = arith.constant 0 : index
    %16 = vector.load %arg6[%c0_11, %c0_12] : memref<128x128xbf16, #tpu.memory_space<vmem>>, vector<128x128xbf16>
    %cst_13 = arith.constant dense<0.000000e+00> : vector<8x128xf32>
    %17 = tpu.matmul %15, %16, %cst_13 {dimension_numbers = #tpu.dot_dimension_numbers<[1], [0], [0], [1], [0, 0, 1, 1], [], []>} : vector<8x128xbf16>, vector<128x128xbf16>, vector<8x128xf32> -> vector<8x128xf32>
    %c0_14 = arith.constant 0 : index
    %c0_15 = arith.constant 0 : index
    %18 = vector.load %arg7[%c0_14, %c0_15] : memref<1x128xf32, #tpu.memory_space<vmem>>, vector<1x128xf32>
    %19 = vector.broadcast %18 : vector<1x128xf32> to vector<8x128xf32>
    %20 = arith.addf %17, %19 : vector<8x128xf32>
    %cst_16 = arith.constant 0.000000e+00 : f32
    %21 = vector.broadcast %cst_16 : f32 to vector<8x128xf32>
    %22 = arith.maximumf %20, %21 : vector<8x128xf32>
    %23 = arith.truncf %22 : vector<8x128xf32> to vector<8x128xbf16>
    %c0_17 = arith.constant 0 : index
    %c0_18 = arith.constant 0 : index
    %24 = vector.load %arg8[%c0_17, %c0_18] : memref<128x128xbf16, #tpu.memory_space<vmem>>, vector<128x128xbf16>
    %cst_19 = arith.constant dense<0.000000e+00> : vector<8x128xf32>
    %25 = tpu.matmul %23, %24, %cst_19 {dimension_numbers = #tpu.dot_dimension_numbers<[1], [0], [0], [1], [0, 0, 1, 1], [], []>} : vector<8x128xbf16>, vector<128x128xbf16>, vector<8x128xf32> -> vector<8x128xf32>
    %c0_20 = arith.constant 0 : index
    %c0_21 = arith.constant 0 : index
    %26 = vector.load %arg9[%c0_20, %c0_21] : memref<1x128xf32, #tpu.memory_space<vmem>>, vector<1x128xf32>
    %27 = vector.broadcast %26 : vector<1x128xf32> to vector<8x128xf32>
    %28 = arith.addf %25, %27 : vector<8x128xf32>
    %cst_22 = arith.constant 0.000000e+00 : f32
    %29 = vector.broadcast %cst_22 : f32 to vector<8x128xf32>
    %30 = arith.maximumf %28, %29 : vector<8x128xf32>
    %c0_23 = arith.constant 0 : index
    %c0_24 = arith.constant 0 : index
    %31 = vector.load %arg10[%c0_23, %c0_24] : memref<1x128xf32, #tpu.memory_space<vmem>>, vector<1x128xf32>
    %c0_25 = arith.constant 0 : index
    %c0_26 = arith.constant 0 : index
    %32 = vector.load %arg11[%c0_25, %c0_26] : memref<1x1xf32, #tpu.memory_space<vmem>>, vector<1x1xf32>
    %33 = vector.broadcast %31 : vector<1x128xf32> to vector<8x128xf32>
    %34 = arith.mulf %30, %33 : vector<8x128xf32>
    %cst_27 = arith.constant dense<0.000000e+00> : vector<8xf32>
    %35 = vector.multi_reduction <add>, %34, %cst_27 [1] : vector<8x128xf32> to vector<8xf32>
    %36 = vector.shape_cast %35 : vector<8xf32> to vector<1x8xf32>
    %37 = vector.broadcast %32 : vector<1x1xf32> to vector<1x8xf32>
    %38 = arith.addf %36, %37 : vector<1x8xf32>
    %c0_28 = arith.constant 0 : index
    %c0_29 = arith.constant 0 : index
    %39 = vector.load %arg12[%c0_28, %c0_29] : memref<1x8xf32, #tpu.memory_space<vmem>>, vector<1x8xf32>
    tpu.vector_store %arg12[%c0_28, %c0_29], %38 {strides = array<i32>} : memref<1x8xf32, #tpu.memory_space<vmem>>, vector<1x8xf32>,
    return
  }
  func.func @transform_0(%arg0: i32) -> (i32, i32) {
    %c0_i32 = arith.constant 0 : i32
    %c0_i32_0 = arith.constant 0 : i32
    return %arg0, %c0_i32 : i32, i32
  }
  func.func @transform_1(%arg0: i32) -> (i32, i32) {
    %c0_i32 = arith.constant 0 : i32
    %c0_i32_0 = arith.constant 0 : i32
    return %arg0, %c0_i32 : i32, i32
  }
  func.func @transform_2(%arg0: i32) -> (i32, i32) {
    %c0_i32 = arith.constant 0 : i32
    %c0_i32_0 = arith.constant 0 : i32
    %c0_i32_1 = arith.constant 0 : i32
    return %c0_i32, %c0_i32_0 : i32, i32
  }
  func.func @transform_3(%arg0: i32) -> (i32, i32) {
    %c0_i32 = arith.constant 0 : i32
    %c0_i32_0 = arith.constant 0 : i32
    %c0_i32_1 = arith.constant 0 : i32
    return %c0_i32, %c0_i32_0 : i32, i32
  }
  func.func @transform_4(%arg0: i32) -> (i32, i32) {
    %c0_i32 = arith.constant 0 : i32
    %c0_i32_0 = arith.constant 0 : i32
    %c0_i32_1 = arith.constant 0 : i32
    return %c0_i32, %c0_i32_0 : i32, i32
  }
  func.func @transform_5(%arg0: i32) -> (i32, i32) {
    %c0_i32 = arith.constant 0 : i32
    %c0_i32_0 = arith.constant 0 : i32
    %c0_i32_1 = arith.constant 0 : i32
    return %c0_i32, %c0_i32_0 : i32, i32
  }
  func.func @transform_6(%arg0: i32) -> (i32, i32) {
    %c0_i32 = arith.constant 0 : i32
    %c0_i32_0 = arith.constant 0 : i32
    %c0_i32_1 = arith.constant 0 : i32
    return %c0_i32, %c0_i32_0 : i32, i32
  }
  func.func @transform_7(%arg0: i32) -> (i32, i32) {
    %c0_i32 = arith.constant 0 : i32
    %c0_i32_0 = arith.constant 0 : i32
    %c0_i32_1 = arith.constant 0 : i32
    return %c0_i32, %c0_i32_0 : i32, i32
  }
  func.func @transform_8(%arg0: i32) -> (i32, i32) {
    %c0_i32 = arith.constant 0 : i32
    %c0_i32_0 = arith.constant 0 : i32
    %c0_i32_1 = arith.constant 0 : i32
    return %c0_i32, %c0_i32_0 : i32, i32
  }
  func.func @transform_9(%arg0: i32) -> (i32, i32) {
    %c0_i32 = arith.constant 0 : i32
    %c0_i32_0 = arith.constant 0 : i32
    %c0_i32_1 = arith.constant 0 : i32
    return %c0_i32, %c0_i32_0 : i32, i32
  }
  func.func @transform_10(%arg0: i32) -> (i32, i32) {
    %c0_i32 = arith.constant 0 : i32
    %c0_i32_0 = arith.constant 0 : i32
    %c0_i32_1 = arith.constant 0 : i32
    return %c0_i32, %c0_i32_0 : i32, i32
  }
  func.func @transform_11(%arg0: i32) -> (i32, i32) {
    %c0_i32 = arith.constant 0 : i32
    %c0_i32_0 = arith.constant 0 : i32
    return %c0_i32, %arg0 : i32, i32
  }
}

</mosaic_0001>

<bundles_post_ra>
// kernel: tpu_custom_call.1
= control target key start
LH: loop header
LB: loop body
LE: loop exit
PB: predicated region body
PF: predicated region fallthrough
CT: control target
= control target key end

     0   :  { %s870_s0 = inlined_call_operand.hbm [shape: s32[8,32], index: 0, kind: input, shape index: {}]   ;;  %s871_s1 = inlined_call_operand.hbm [shape: f32[8,96], index: 1, kind: input, shape index: {}]   ;;  %s872_s2 = inlined_call_operand.hbm [shape: bf16[32,128], index: 2, kind: input, shape index: {}]   ;;  %s873_s3 = inlined_call_operand.hbm [shape: bf16[96,128], index: 3, kind: input, shape index: {}]   ;;  %s874_s4 = inlined_call_operand.vmem [shape: f32[1,128], index: 4, kind: input, shape index: {}]   ;;  %s875_s5 = inlined_call_operand.hbm [shape: bf16[128,128], index: 5, kind: input, shape index: {}]   ;;  %s876_s6 = inlined_call_operand.vmem [shape: f32[1,128], index: 6, kind: input, shape index: {}]   ;;  %s877_s7 = inlined_call_operand.hbm [shape: bf16[128,128], index: 7, kind: input, shape index: {}]   ;;  %s878_s8 = inlined_call_operand.vmem [shape: f32[1,128], index: 8, kind: input, shape index: {}]   ;;  %s879_s9 = inlined_call_operand.vmem [shape: f32[1,128], index: 9, kind: input, shape index: {}]   ;;  %s880_s10 = inlined_call_operand.<no memory space> [shape: f32[1,1], index: 10, kind: input, shape index: {}]   ;;  %s881_s11 = inlined_call_operand.hbm [shape: f32[1,8], index: 11, kind: output, shape index: {}]  }
   0x1   :  { %v16_v0 = vstv %s880_s10 }
   0x2   :  { %17 = vst [vmem:[#allocation2] sm:$0x1] %v16_v0 }
   0x3   :  { %18 = vsyncpa [#allocation4], 0 }
   0x4   :  { %19 = vsyncpa [#allocation7], 0 }
   0x5   :  { %20 = vsyncpa [#allocation10], 0 }
   0x6   :  { %21 = vsyncpa [#allocation13], 0  ;;  %s39_s21 = sshll.u32 %s871_s1, 4  ;;  %s40_s21 = int_to_ptr.hbm [resolvable:$true] %s39_s21 }
   0x7   :  { %22 = vsyncpa [#allocation5], 0  ;;  %s764_s22 = smov [#allocation6]   ;;  %s62_s26 = sshll.u32 %s873_s3, 4  ;;  %s63_s26 = int_to_ptr.hbm [resolvable:$true] %s62_s26 }
   0x8   :  { %s41_s23 = sshll.u32 %s764_s22, 4  ;;  %s765_s10 = smov [#allocation9]   ;;  %s42_s23 = int_to_ptr.vmem [resolvable:$true] %s41_s23 }
   0x9   :  { %44 = dma.hbm_to_vmem [thread:$0]  %s40_s21, 128, %s42_s23, [#allocation7]  }
   0xa   :  { %s64_s27 = sshll.u32 %s765_s10, 4  ;;  %s28_s30 = sshll.u32 %s870_s0, 4  ;;  %s65_s27 = int_to_ptr.vmem [resolvable:$true] %s64_s27  ;;  %s29_s30 = int_to_ptr.hbm [resolvable:$true] %s28_s30 }
   0xb   :  { %s766_s1 = smov 64   ;;  %s767_s12 = smov 4  }
   0xc   :  { %70 = dma.hbm_to_vmem [thread:$0]  %s63_s26, 768, %s65_s27, [#allocation10], %s766_s1, %s766_s1, %s767_s12  }
   0xd   :  { %s49_s15 = sshll.u32 %s872_s2, 4  ;;  %s768_s16 = smov [#allocation3]   ;;  %s50_s15 = int_to_ptr.hbm [resolvable:$true] %s49_s15 }
   0xe   :  { %s30_s17 = sshll.u32 %s768_s16, 4  ;;  %s769_s3 = smov [#allocation8]   ;;  %s31_s17 = int_to_ptr.vmem [resolvable:$true] %s30_s17 }
   0xf   :  { %33 = dma.hbm_to_vmem [thread:$0]  %s29_s30, 128, %s31_s17, [#allocation4]  }
  0x10   :  { %s51_s18 = sshll.u32 %s769_s3, 4  ;;  %s77_s0 = sshll.u32 %s875_s5, 4  ;;  %s52_s18 = int_to_ptr.vmem [resolvable:$true] %s51_s18  ;;  %s78_s0 = int_to_ptr.hbm [resolvable:$true] %s77_s0 }
  0x11   :  { %57 = dma.hbm_to_vmem [thread:$0]  %s50_s15, 256, %s52_s18, [#allocation7], %s766_s1, %s766_s1, %s767_s12  }
  0x12   :  { %s92_s23 = sshll.u32 %s877_s7, 4  ;;  %s770_s24 = smov [#allocation11]   ;;  %s93_s23 = int_to_ptr.hbm [resolvable:$true] %s92_s23 }
  0x13   :  { %s79_s2 = sshll.u32 %s770_s24, 4  ;;  %s771_s25 = smov [#allocation12]   ;;  %s80_s2 = int_to_ptr.vmem [resolvable:$true] %s79_s2 }
  0x14   :  { %85 = dma.hbm_to_vmem [thread:$0]  %s78_s0, 1024, %s80_s2, [#allocation10], %s766_s1, %s766_s1, %s767_s12  }
  0x15   :  { %s94_s26 = sshll.u32 %s771_s25, 4  ;;  %s95_s26 = int_to_ptr.vmem [resolvable:$true] %s94_s26 }
  0x16   :  { %100 = dma.hbm_to_vmem [thread:$0]  %s93_s23, 1024, %s95_s26, [#allocation13], %s766_s1, %s766_s1, %s767_s12  }
  0x17   :  { %754 = dma.done.wait [#allocation4], 128  }
  0x18   :  { %755 = vsyncadd [#allocation4], 4294967168 }
  0x19   :  { %756 = dma.done.wait [#allocation7], 384  }
  0x1a   :  { %757 = vsyncadd [#allocation7], 4294966912 }
  0x1b   :  { %758 = dma.done.wait [#allocation10], 1792  }
  0x1c   :  { %759 = vsyncadd [#allocation10], 4294965504 }
  0x1d   :  { %760 = dma.done.wait [#allocation13], 1024  }
  0x1e   :  { %761 = vsyncadd [#allocation13], 4294966272  ;;  %v554_v1 = vld [vmem:[#allocation9 + $0x28] sm:$0xff]  ;;  %v548_v2 = vld [vmem:[#allocation8 + $0x8] sm:$0xff]  ;;  %vm218_vm0 = vcmask 261120   ;;  %vm189_vm1 = vcmask 785408   ;;  %v423_v55 = vlaneseq }
  0x1f   :  { %195 = vmatpush.bf16.msra.mxu0 %v554_v1  ;;  %v553_v3 = vld [vmem:[#allocation9 + $0x20] sm:$0xff]  ;;  %228 = vmatpush.bf16.msra.mxu1 %v548_v2  ;;  %v547_v5 = vld [vmem:[#allocation8] sm:$0xff]  ;;  %v562_v7 = vld [vmem:[#allocation11 + $0x38] sm:$0xff]  ;;  %v772_v40 = vmov 0   ;;  %vm427_vm2 = vcmask 57344  }
  0x20   :  { %v132_v4 = vld [vmem:[#allocation3] sm:$0xff]  ;;  %310 = vmatpush.bf16.msra.mxu2 %v562_v7  ;;  %v552_v9 = vld [vmem:[#allocation9 + $0x18] sm:$0xff]  ;;  %v551_v12 = vld [vmem:[#allocation9 + $0x10] sm:$0xff]  ;;  %581 = vset.pattern.permute.xlu0 %v772_v40  ;;  %v424_v57 = vand.u32 127, %v423_v55 }
  0x21   :  { %v133_v6 = vcvt.s32.f32 %v132_v4  ;;  %v561_v8 = vld [vmem:[#allocation11 + $0x30] sm:$0xff]  ;;  %v560_v11 = vld [vmem:[#allocation11 + $0x28] sm:$0xff]  ;;  %v559_v13 = vld [vmem:[#allocation11 + $0x20] sm:$0xff] }
  0x22   :  { %v550_v14 = vld [vmem:[#allocation9 + $0x8] sm:$0xff]  ;;  %v549_v15 = vld [vmem:[#allocation9] sm:$0xff]  ;;  %v556_v20 = vld [vmem:[#allocation11 + $0x8] sm:$0xff] }
  0x23   :  { %196 = vmatpush.bf16.msra.mxu0 %v553_v3  ;;  %v134_v10 = vpack.c.bf16 %v133_v6, %v133_v6  ;;  %229 = vmatpush.bf16.msra.mxu1 %v547_v5  ;;  %v139_v16 = vld [vmem:[#allocation6] sm:$0xff]  ;;  %v557_v19 = vld [vmem:[#allocation11 + $0x10] sm:$0xff]  ;;  %v555_v21 = vld [vmem:[#allocation11] sm:$0xff] }
  0x24   :  { %311 = vmatpush.bf16.msra.mxu2 %v561_v8  ;;  %v140_v17 = vpack.c.bf16 %v139_v16, %v139_v16  ;;  %v558_v18 = vld [vmem:[#allocation11 + $0x18] sm:$0xff]  ;;  %v569_v23 = vld [vmem:[#allocation12 + $0x30] sm:$0xff]  ;;  %v568_v24 = vld [vmem:[#allocation12 + $0x28] sm:$0xff] }
  0x25   :  { %v570_v22 = vld [vmem:[#allocation12 + $0x38] sm:$0xff]  ;;  %v567_v26 = vld [vmem:[#allocation12 + $0x20] sm:$0xff]  ;;  %v565_v29 = vld [vmem:[#allocation12 + $0x10] sm:$0xff] }
  0x26   :  { %482 = vmatmul.msk.bf16.vlgmr.msra.gmra.mxu1 %vm218_vm0, %v134_v10  ;;  %393 = vmatpush.bf16.msra.mxu3 %v570_v22  ;;  %v566_v27 = vld [vmem:[#allocation12 + $0x18] sm:$0xff]  ;;  %v582_v30 = vld [vmem:[%s874_s4] ss:$0 sm:$0xff]  ;;  %v563_v38 = vld [vmem:[#allocation12] sm:$0xff] }
  0x27   :  { %197 = vmatpush.bf16.msra.mxu0 %v552_v9  ;;  %v564_v37 = vld [vmem:[#allocation12 + $0x8] sm:$0xff] }
  0x28   :  { %312 = vmatpush.bf16.msra.mxu2 %v560_v11  ;;  %v408_v39 = vld [vmem:[#allocation2] sm:$0x1] }
  0x29   :  { %417 = vperm.xlu0 %581, %v408_v39   ;;  %v583_v41 = vld [vmem:[%s876_s6] ss:$0 sm:$0xff]  ;;  %s773_s6 = smov [#allocation14]  }
  0x2a   :  { %394 = vmatpush.bf16.msra.mxu3 %v569_v23  ;;  %v584_v47 = vld [vmem:[%s878_s8] ss:$0 sm:$0xff]  ;;  %s434_s1 = sshll.u32 %s773_s6, 4  ;;  %s436_s8 = sshll.u32 %s881_s11, 4  ;;  %s435_s1 = int_to_ptr.vmem [resolvable:$true] %s434_s1  ;;  %s437_s8 = int_to_ptr.hbm [resolvable:$true] %s436_s8 }
  0x2b   :  { %198 = vmatpush.bf16.msra.mxu0 %v551_v12  ;;  %v585_v50 = vld [vmem:[%s879_s9] ss:$0 sm:$0xff] }
  0x2c   :  { %313 = vmatpush.bf16.msra.mxu2 %v559_v13 }
  0x2e   :  { %395 = vmatpush.bf16.msra.mxu3 %v568_v24 }
  0x2f   :  { %199 = vmatpush.bf16.msra.mxu0 %v550_v14 }
  0x30   :  { %314 = vmatpush.bf16.msra.mxu2 %v558_v18 }
  0x32   :  { %396 = vmatpush.bf16.msra.mxu3 %v567_v26 }
  0x33   :  { %200 = vmatpush.bf16.msra.mxu0 %v549_v15 }
  0x34   :  { %315 = vmatpush.bf16.msra.mxu2 %v557_v19 }
  0x36   :  { %473 = vmatmul.msk.bf16.vlgmr.msra.gmra.mxu0 %vm189_vm1, %v140_v17  ;;  %397 = vmatpush.bf16.msra.mxu3 %v566_v27 }
  0x38   :  { %316 = vmatpush.bf16.msra.mxu2 %v556_v20 }
  0x3a   :  { %398 = vmatpush.bf16.msra.mxu3 %v565_v29 }
  0x3c   :  { %317 = vmatpush.bf16.msra.mxu2 %v555_v21 }
  0x3e   :  { %399 = vmatpush.bf16.msra.mxu3 %v564_v37 }
  0x42   :  { %400 = vmatpush.bf16.msra.mxu3 %v563_v38 }
  0x9b   :  { %v418_v54 = vpop.permute.xlu0 %417 }
  0x9c   :  { %v420_v56 = vperm.slane %v418_v54, 0 }
  0xa3   :  { %v231_v25 = vpop.f32.mrf.mxu1 }
  0xab   :  { %v233_v28 = vpop.f32.mrf.mxu1 }
  0xb3   :  { %v202_v31 = vpop.f32.mrf.mxu0 }
  0xb4   :  { %v232_v32 = vadd.f32 %v231_v25, %v202_v31 }
  0xb6   :  { %v239_v33 = vadd.f32 %v582_v30, %v232_v32 }
  0xb8   :  { %v240_v34 = vmax.f32 %v239_v33, 0.0 }
  0xba   :  { %v241_v35 = vpack.c.bf16 %v240_v34, %v240_v34 }
  0xbb   :  { %v204_v36 = vpop.f32.mrf.mxu0 }
  0xbc   :  { %318 = vmatmul.bf16.vlgmr.msra.gmra.mxu2 %v241_v35 }
 0x13f   :  { %v319_v42 = vpop.f32.mrf.mxu2 }
 0x140   :  { %v320_v43 = vadd.f32 %v583_v41, %v319_v42 }
 0x142   :  { %v323_v44 = vmax.f32 %v320_v43, 0.0 }
 0x144   :  { %v324_v45 = vpack.c.bf16 %v323_v44, %v323_v44 }
 0x146   :  { %401 = vmatmul.bf16.vlgmr.msra.gmra.mxu3 %v324_v45 }
 0x147   :  { %v321_v46 = vpop.f32.mrf.mxu2 }
 0x1c9   :  { %v402_v48 = vpop.f32.mrf.mxu3 }
 0x1ca   :  { %v403_v49 = vadd.f32 %v584_v47, %v402_v48 }
 0x1cc   :  { %v406_v51 = vmax.f32 %v403_v49, 0.0 }
 0x1ce   :  { %v412_v52 = vmul.f32 %v585_v50, %v406_v51 }
 0x1d0   :  { %413 = vadd.xlane.f32.xlu0 %v412_v52 }
 0x1d1   :  { %v404_v53 = vpop.f32.mrf.mxu3 }
 0x243   :  { %v414_v58 = vpop.xlane.xlu0 %413 }
 0x244   :  { %v421_v59 = vadd.f32 %v420_v56, %v414_v58 }
 0x246   :  { %v425_v60 = vperm.slane %v421_v59, %v424_v57 }
 0x248   :  { %428 = vst.msk [vmem:[#allocation14] sm:$0x1] %vm427_vm2, %v425_v60 }
 0x249   :  { %439 = dma.vmem_to_hbm [thread:$0]  %s435_s1, 16, %s437_s8, [#allocation5]  }
 0x24a   :  { %762 = dma.done.wait [#allocation5], 16  }
 0x24b   :  { %763 = vsyncadd [#allocation5], 4294967280 }
 0x24c   :  { %444 = vsyncpa [#allocation4], 1 }
 0x24d   :  { %445 = vsyncpa [#allocation7], 1 }
 0x24e   :  { %446 = vsyncpa [#allocation10], 1 }
 0x24f   :  { %447 = vsyncpa [#allocation13], 1 }
 0x250   :  { %448 = vsyncpa [#allocation5], 1 }

</bundles_post_ra>
